<compile_context>
chip_gen: v7x
topology: tpu7x:2x2x1
jax: 0.10.0
libtpu: 0.0.40
codegen_flags: <defaults>
</compile_context>

<pallas_src>
import functools

import jax
import jax.numpy as jnp
from jax import lax
from jax.experimental import pallas as pl
from jax.experimental.pallas import tpu as pltpu


def _gru_kernel(x_ref,                       # (S, TM, F) time-major input rows
                wx_ref, bx_ref,              # (F, 3F), (1, 3F): fused x -> [r|z|cand]
                whr_ref, whz_ref, whu_ref,   # (F, F): hx -> r / z / candidate
                w_ref, b_ref,                # output head (F, F), (1, F)
                yt_ref, hy_ref,              # (TM, F) outputs (last timestep)
                xr_scr, xz_scr, xu_scr,      # (S, TM, F) VMEM scratch
                *, seq_len, rows, feat):
    # ---- Phase 1: recurrence-independent input projections for all timesteps,
    # as ONE big MXU matmul; per-gate lane split happens once, off the serial
    # critical path (static offsets, XLU work hidden under MXU).
    x2d = x_ref[...].reshape(seq_len * rows, feat)
    proj = (jnp.dot(x2d, wx_ref[...], preferred_element_type=jnp.float32)
            + bx_ref[...])                                   # (S*rows, 3F)
    xr_scr[...] = proj[:, 0 * feat:1 * feat].reshape(seq_len, rows, feat)
    xz_scr[...] = proj[:, 1 * feat:2 * feat].reshape(seq_len, rows, feat)
    xu_scr[...] = proj[:, 2 * feat:3 * feat].reshape(seq_len, rows, feat)

    # ---- Phase 2: serial recurrence. hx carried as a value; hidden-state
    # weights hoisted; only the small hx / (r*hx) matmuls per step remain.
    whr = whr_ref[...]
    whz = whz_ref[...]
    whu = whu_ref[...]

    def step(t, hx):
        r = jax.nn.sigmoid(xr_scr[t] +
                           jnp.dot(hx, whr, preferred_element_type=jnp.float32))
        z = jax.nn.sigmoid(xz_scr[t] +
                           jnp.dot(hx, whz, preferred_element_type=jnp.float32))
        cy = jnp.tanh(xu_scr[t] +
                      jnp.dot(r * hx, whu, preferred_element_type=jnp.float32))
        return z * hx + (1.0 - z) * cy

    hy = lax.fori_loop(0, seq_len, step,
                       jnp.zeros((rows, feat), jnp.float32),
                       unroll=(seq_len <= 16))

    hy_ref[...] = hy.astype(hy_ref.dtype)
    yt = jax.nn.sigmoid(jnp.dot(hy, w_ref[...], preferred_element_type=jnp.float32)
                        + b_ref[...])
    yt_ref[...] = yt.astype(yt_ref.dtype)


def encoder_linear_forward(inputs, params, *, row_block=None):
    """inputs: (B, S, N, F) float32. params: input-major weights (see make_params)."""
    B, S, N, F = inputs.shape
    M = B * N

    # Time-major, rows flattened; pad rows to a multiple of 8 for clean layout.
    Mp = ((M + 7) // 8) * 8
    x = jnp.transpose(inputs, (1, 0, 2, 3)).reshape(S, M, F)
    if Mp != M:
        x = jnp.pad(x, ((0, 0), (0, Mp - M), (0, 0)))

    # Split the fused PyTorch weights once (free, on host-side XLA) so the
    # kernel never concatenates along lanes during the recurrence.
    wg, bg = params["gate_w"], params["gate_b"]        # (2F, 2F), (1, 2F)
    wu, bu = params["update_w"], params["update_b"]    # (2F, F),  (1, F)
    W, b = params["W"], params["b"]                    # (F, F),   (1, F)

    wxr, wxz = wg[:F, :F], wg[:F, F:]                  # x   -> r, z
    whr, whz = wg[F:, :F], wg[F:, F:]                  # hx  -> r, z
    br, bz = bg[:, :F], bg[:, F:]
    wxu, whu = wu[:F, :], wu[F:, :]                    # x / (r*hx) -> candidate

    # Fuse all recurrence-independent input projections into one RHS so
    # phase 1 is a single MXU pass over the (S*M, F) input slab.
    wx_all = jnp.concatenate([wxr, wxz, wxu], axis=1)  # (F, 3F)
    bx_all = jnp.concatenate([br, bz, bu], axis=1)     # (1, 3F)

    # Optional row blocking (e.g. to shard M across v7x's two TensorCores).
    if row_block is None or Mp % row_block != 0 or row_block % 8 != 0:
        row_block = Mp
    n_blocks = Mp // row_block

    kernel = functools.partial(_gru_kernel, seq_len=S, rows=row_block, feat=F)
    wmap = lambda i: (0, 0)

    yt, hy = pl.pallas_call(
        kernel,
        out_shape=(jax.ShapeDtypeStruct((Mp, F), jnp.float32),
                   jax.ShapeDtypeStruct((Mp, F), jnp.float32)),
        grid_spec=pltpu.PrefetchScalarGridSpec(
            num_scalar_prefetch=0,
            grid=(n_blocks,),
            in_specs=[
                pl.BlockSpec((S, row_block, F), lambda i: (0, i, 0)),  # x slab
                pl.BlockSpec((F, 3 * F), wmap),  # wx_all
                pl.BlockSpec((1, 3 * F), wmap),  # bx_all
                pl.BlockSpec((F, F), wmap),      # whr
                pl.BlockSpec((F, F), wmap),      # whz
                pl.BlockSpec((F, F), wmap),      # whu
                pl.BlockSpec((F, F), wmap),      # W
                pl.BlockSpec((1, F), wmap),      # b
            ],
            out_specs=[
                pl.BlockSpec((row_block, F), lambda i: (i, 0)),        # yt
                pl.BlockSpec((row_block, F), lambda i: (i, 0)),        # hy
            ],
            scratch_shapes=[
                pltpu.VMEM((S, row_block, F), jnp.float32),
                pltpu.VMEM((S, row_block, F), jnp.float32),
                pltpu.VMEM((S, row_block, F), jnp.float32),
            ],
        ),
        compiler_params=pltpu.CompilerParams(
            dimension_semantics=("parallel",)),
    )(x, wx_all, bx_all, whr, whz, whu, W, b)

    yt = yt[:M].reshape(B, N, F)
    hy = hy[:M].reshape(B, N, F)
    return yt, hy


def _reference_forward(inputs, params):
    """Plain-JAX reference mirroring the PyTorch loop (for a sanity check)."""
    B, S, N, F = inputs.shape
    hx = jnp.zeros((B, N, F), jnp.float32)
    yt = None
    for t in range(S):
        x = inputs[:, t]
        combined = jnp.concatenate([x, hx], axis=2)
        gates = combined @ params["gate_w"] + params["gate_b"][0]
        r = jax.nn.sigmoid(gates[..., :F])
        z = jax.nn.sigmoid(gates[..., F:])
        comb2 = jnp.concatenate([x, r * hx], axis=2)
        cy = jnp.tanh(comb2 @ params["update_w"] + params["update_b"][0])
        hy = z * hx + (1.0 - z) * cy
        hx = hy
        yt = jax.nn.sigmoid(hy @ params["W"] + params["b"][0])
    return yt, hx


def make_params(key, feat):
    """Deterministic parameter init (PyTorch stores Linear weights as (out,in);
    we keep them pre-transposed to (in,out) so the kernel does x @ W directly)."""
    ks = jax.random.split(key, 6)
    scale = 0.1
    return {
        "gate_w": scale * jax.random.normal(ks[0], (2 * feat, 2 * feat), jnp.float32),
        "gate_b": scale * jax.random.normal(ks[1], (1, 2 * feat), jnp.float32),
        "update_w": scale * jax.random.normal(ks[2], (2 * feat, feat), jnp.float32),
        "update_b": scale * jax.random.normal(ks[3], (1, feat), jnp.float32),
        "W": scale * jax.random.normal(ks[4], (feat, feat), jnp.float32),
        "b": scale * jax.random.normal(ks[5], (1, feat), jnp.float32),
    }


if __name__ == "__main__":
    key = jax.random.PRNGKey(0)
    k_in, k_par = jax.random.split(key)

    B, S, N, F = 2, 4, 8, 32          # batch, seq_len, num_vertices, feature
    inputs = jax.random.normal(k_in, (B, S, N, F), jnp.float32)
    params = make_params(k_par, F)

    yt, hy = encoder_linear_forward(inputs, params)
    yt = jax.block_until_ready(yt)
    hy = jax.block_until_ready(hy)

    yt_ref, hy_ref = _reference_forward(inputs, params)
    assert jnp.allclose(yt, yt_ref, atol=1e-3, rtol=1e-3)
    assert jnp.allclose(hy, hy_ref, atol=1e-3, rtol=1e-3)

    print("KERNEL_OK")
</pallas_src>

<mosaic_0001>
module attributes {stable_mosaic.version = 11 : i64} {
  func.func @_gru_kernel(%arg0: i32, %arg1: memref<4x16x32xf32, #tpu.memory_space<vmem>>, %arg2: memref<32x96xf32, #tpu.memory_space<vmem>>, %arg3: memref<1x96xf32, #tpu.memory_space<vmem>>, %arg4: memref<32x32xf32, #tpu.memory_space<vmem>>, %arg5: memref<32x32xf32, #tpu.memory_space<vmem>>, %arg6: memref<32x32xf32, #tpu.memory_space<vmem>>, %arg7: memref<32x32xf32, #tpu.memory_space<vmem>>, %arg8: memref<1x32xf32, #tpu.memory_space<vmem>>, %arg9: memref<16x32xf32, #tpu.memory_space<vmem>>, %arg10: memref<16x32xf32, #tpu.memory_space<vmem>>, %arg11: memref<4x16x32xf32, #tpu.memory_space<vmem>>, %arg12: memref<4x16x32xf32, #tpu.memory_space<vmem>>, %arg13: memref<4x16x32xf32, #tpu.memory_space<vmem>>) attributes {dimension_semantics = [#tpu.dimension_semantics<parallel>], iteration_bounds = array<i64: 1>, scalar_prefetch = 0 : i64, scratch_operands = 3 : i64, tpu.core_type = #tpu.core_type<tc>, window_params = [{transform_indices = @transform_0, window_bounds = array<i64: 4, 16, 32>}, {pipeline_mode = #tpu.pipeline_mode<synchronous>, transform_indices = @transform_1, window_bounds = array<i64: 32, 96>}, {pipeline_mode = #tpu.pipeline_mode<synchronous>, transform_indices = @transform_2, window_bounds = array<i64: 1, 96>}, {pipeline_mode = #tpu.pipeline_mode<synchronous>, transform_indices = @transform_3, window_bounds = array<i64: 32, 32>}, {pipeline_mode = #tpu.pipeline_mode<synchronous>, transform_indices = @transform_4, window_bounds = array<i64: 32, 32>}, {pipeline_mode = #tpu.pipeline_mode<synchronous>, transform_indices = @transform_5, window_bounds = array<i64: 32, 32>}, {pipeline_mode = #tpu.pipeline_mode<synchronous>, transform_indices = @transform_6, window_bounds = array<i64: 32, 32>}, {pipeline_mode = #tpu.pipeline_mode<synchronous>, transform_indices = @transform_7, window_bounds = array<i64: 1, 32>}, {transform_indices = @transform_8, window_bounds = array<i64: 16, 32>}, {transform_indices = @transform_9, window_bounds = array<i64: 16, 32>}]} {
    %c0 = arith.constant 0 : index
    %c0_0 = arith.constant 0 : index
    %c0_1 = arith.constant 0 : index
    %0 = vector.load %arg1[%c0, %c0_0, %c0_1] : memref<4x16x32xf32, #tpu.memory_space<vmem>>, vector<4x16x32xf32>
    %1 = vector.shape_cast %0 : vector<4x16x32xf32> to vector<64x32xf32>
    %c0_2 = arith.constant 0 : index
    %c0_3 = arith.constant 0 : index
    %2 = vector.load %arg2[%c0_2, %c0_3] : memref<32x96xf32, #tpu.memory_space<vmem>>, vector<32x96xf32>
    %cst = arith.constant dense<0.000000e+00> : vector<64x96xf32>
    %3 = tpu.matmul %1, %2, %cst {dimension_numbers = #tpu.dot_dimension_numbers<[1], [0], [0], [1], [0, 0, 1, 1], [], []>} : vector<64x32xf32>, vector<32x96xf32>, vector<64x96xf32> -> vector<64x96xf32>
    %c0_4 = arith.constant 0 : index
    %c0_5 = arith.constant 0 : index
    %4 = vector.load %arg3[%c0_4, %c0_5] : memref<1x96xf32, #tpu.memory_space<vmem>>, vector<1x96xf32>
    %5 = vector.broadcast %4 : vector<1x96xf32> to vector<64x96xf32>
    %6 = arith.addf %3, %5 : vector<64x96xf32>
    %7 = vector.extract_strided_slice %6 {offsets = [0, 0], sizes = [64, 32], strides = [1, 1]} : vector<64x96xf32> to vector<64x32xf32>
    %8 = vector.shape_cast %7 : vector<64x32xf32> to vector<4x16x32xf32>
    %c0_6 = arith.constant 0 : index
    %c0_7 = arith.constant 0 : index
    %c0_8 = arith.constant 0 : index
    %9 = vector.load %arg11[%c0_6, %c0_7, %c0_8] : memref<4x16x32xf32, #tpu.memory_space<vmem>>, vector<4x16x32xf32>
    tpu.vector_store %arg11[%c0_6, %c0_7, %c0_8], %8 {strides = array<i32>} : memref<4x16x32xf32, #tpu.memory_space<vmem>>, vector<4x16x32xf32>,
    %10 = vector.extract_strided_slice %6 {offsets = [0, 32], sizes = [64, 32], strides = [1, 1]} : vector<64x96xf32> to vector<64x32xf32>
    %11 = vector.shape_cast %10 : vector<64x32xf32> to vector<4x16x32xf32>
    %c0_9 = arith.constant 0 : index
    %c0_10 = arith.constant 0 : index
    %c0_11 = arith.constant 0 : index
    %12 = vector.load %arg12[%c0_9, %c0_10, %c0_11] : memref<4x16x32xf32, #tpu.memory_space<vmem>>, vector<4x16x32xf32>
    tpu.vector_store %arg12[%c0_9, %c0_10, %c0_11], %11 {strides = array<i32>} : memref<4x16x32xf32, #tpu.memory_space<vmem>>, vector<4x16x32xf32>,
    %13 = vector.extract_strided_slice %6 {offsets = [0, 64], sizes = [64, 32], strides = [1, 1]} : vector<64x96xf32> to vector<64x32xf32>
    %14 = vector.shape_cast %13 : vector<64x32xf32> to vector<4x16x32xf32>
    %c0_12 = arith.constant 0 : index
    %c0_13 = arith.constant 0 : index
    %c0_14 = arith.constant 0 : index
    %15 = vector.load %arg13[%c0_12, %c0_13, %c0_14] : memref<4x16x32xf32, #tpu.memory_space<vmem>>, vector<4x16x32xf32>
    tpu.vector_store %arg13[%c0_12, %c0_13, %c0_14], %14 {strides = array<i32>} : memref<4x16x32xf32, #tpu.memory_space<vmem>>, vector<4x16x32xf32>,
    %c0_15 = arith.constant 0 : index
    %c0_16 = arith.constant 0 : index
    %16 = vector.load %arg4[%c0_15, %c0_16] : memref<32x32xf32, #tpu.memory_space<vmem>>, vector<32x32xf32>
    %c0_17 = arith.constant 0 : index
    %c0_18 = arith.constant 0 : index
    %17 = vector.load %arg5[%c0_17, %c0_18] : memref<32x32xf32, #tpu.memory_space<vmem>>, vector<32x32xf32>
    %c0_19 = arith.constant 0 : index
    %c0_20 = arith.constant 0 : index
    %18 = vector.load %arg6[%c0_19, %c0_20] : memref<32x32xf32, #tpu.memory_space<vmem>>, vector<32x32xf32>
    %cst_21 = arith.constant 0.000000e+00 : f32
    %19 = vector.broadcast %cst_21 : f32 to vector<16x32xf32>
    %c0_i32 = arith.constant 0 : i32
    %20 = arith.index_cast %c0_i32 : i32 to index
    %c0_22 = arith.constant 0 : index
    %c0_23 = arith.constant 0 : index
    %21 = vector.load %arg11[%20, %c0_22, %c0_23] : memref<4x16x32xf32, #tpu.memory_space<vmem>>, vector<1x16x32xf32>
    %22 = vector.shape_cast %21 : vector<1x16x32xf32> to vector<16x32xf32>
    %cst_24 = arith.constant dense<0.000000e+00> : vector<16x32xf32>
    %23 = tpu.matmul %19, %16, %cst_24 {dimension_numbers = #tpu.dot_dimension_numbers<[1], [0], [0], [1], [0, 0, 1, 1], [], []>} : vector<16x32xf32>, vector<32x32xf32>, vector<16x32xf32> -> vector<16x32xf32>
    %24 = arith.addf %22, %23 : vector<16x32xf32>
    %25 = arith.negf %24 : vector<16x32xf32>
    %26 = math.exp %25 : vector<16x32xf32>
    %cst_25 = arith.constant 1.000000e+00 : f32
    %27 = vector.broadcast %cst_25 : f32 to vector<16x32xf32>
    %28 = arith.addf %27, %26 : vector<16x32xf32>
    %29 = arith.divf %27, %28 : vector<16x32xf32>
    %30 = arith.index_cast %c0_i32 : i32 to index
    %c0_26 = arith.constant 0 : index
    %c0_27 = arith.constant 0 : index
    %31 = vector.load %arg12[%30, %c0_26, %c0_27] : memref<4x16x32xf32, #tpu.memory_space<vmem>>, vector<1x16x32xf32>
    %32 = vector.shape_cast %31 : vector<1x16x32xf32> to vector<16x32xf32>
    %cst_28 = arith.constant dense<0.000000e+00> : vector<16x32xf32>
    %33 = tpu.matmul %19, %17, %cst_28 {dimension_numbers = #tpu.dot_dimension_numbers<[1], [0], [0], [1], [0, 0, 1, 1], [], []>} : vector<16x32xf32>, vector<32x32xf32>, vector<16x32xf32> -> vector<16x32xf32>
    %34 = arith.addf %32, %33 : vector<16x32xf32>
    %35 = arith.negf %34 : vector<16x32xf32>
    %36 = math.exp %35 : vector<16x32xf32>
    %cst_29 = arith.constant 1.000000e+00 : f32
    %37 = vector.broadcast %cst_29 : f32 to vector<16x32xf32>
    %38 = arith.addf %37, %36 : vector<16x32xf32>
    %39 = arith.divf %37, %38 : vector<16x32xf32>
    %40 = arith.index_cast %c0_i32 : i32 to index
    %c0_30 = arith.constant 0 : index
    %c0_31 = arith.constant 0 : index
    %41 = vector.load %arg13[%40, %c0_30, %c0_31] : memref<4x16x32xf32, #tpu.memory_space<vmem>>, vector<1x16x32xf32>
    %42 = vector.shape_cast %41 : vector<1x16x32xf32> to vector<16x32xf32>
    %43 = arith.mulf %29, %19 : vector<16x32xf32>
    %cst_32 = arith.constant dense<0.000000e+00> : vector<16x32xf32>
    %44 = tpu.matmul %43, %18, %cst_32 {dimension_numbers = #tpu.dot_dimension_numbers<[1], [0], [0], [1], [0, 0, 1, 1], [], []>} : vector<16x32xf32>, vector<32x32xf32>, vector<16x32xf32> -> vector<16x32xf32>
    %45 = arith.addf %42, %44 : vector<16x32xf32>
    %46 = math.tanh %45 : vector<16x32xf32>
    %47 = arith.mulf %39, %19 : vector<16x32xf32>
    %cst_33 = arith.constant 1.000000e+00 : f32
    %48 = vector.broadcast %cst_33 : f32 to vector<16x32xf32>
    %49 = arith.subf %48, %39 : vector<16x32xf32>
    %50 = arith.mulf %49, %46 : vector<16x32xf32>
    %51 = arith.addf %47, %50 : vector<16x32xf32>
    %c1_i32 = arith.constant 1 : i32
    %52 = arith.index_cast %c1_i32 : i32 to index
    %c0_34 = arith.constant 0 : index
    %c0_35 = arith.constant 0 : index
    %53 = vector.load %arg11[%52, %c0_34, %c0_35] : memref<4x16x32xf32, #tpu.memory_space<vmem>>, vector<1x16x32xf32>
    %54 = vector.shape_cast %53 : vector<1x16x32xf32> to vector<16x32xf32>
    %cst_36 = arith.constant dense<0.000000e+00> : vector<16x32xf32>
    %55 = tpu.matmul %51, %16, %cst_36 {dimension_numbers = #tpu.dot_dimension_numbers<[1], [0], [0], [1], [0, 0, 1, 1], [], []>} : vector<16x32xf32>, vector<32x32xf32>, vector<16x32xf32> -> vector<16x32xf32>
    %56 = arith.addf %54, %55 : vector<16x32xf32>
    %57 = arith.negf %56 : vector<16x32xf32>
    %58 = math.exp %57 : vector<16x32xf32>
    %cst_37 = arith.constant 1.000000e+00 : f32
    %59 = vector.broadcast %cst_37 : f32 to vector<16x32xf32>
    %60 = arith.addf %59, %58 : vector<16x32xf32>
    %61 = arith.divf %59, %60 : vector<16x32xf32>
    %62 = arith.index_cast %c1_i32 : i32 to index
    %c0_38 = arith.constant 0 : index
    %c0_39 = arith.constant 0 : index
    %63 = vector.load %arg12[%62, %c0_38, %c0_39] : memref<4x16x32xf32, #tpu.memory_space<vmem>>, vector<1x16x32xf32>
    %64 = vector.shape_cast %63 : vector<1x16x32xf32> to vector<16x32xf32>
    %cst_40 = arith.constant dense<0.000000e+00> : vector<16x32xf32>
    %65 = tpu.matmul %51, %17, %cst_40 {dimension_numbers = #tpu.dot_dimension_numbers<[1], [0], [0], [1], [0, 0, 1, 1], [], []>} : vector<16x32xf32>, vector<32x32xf32>, vector<16x32xf32> -> vector<16x32xf32>
    %66 = arith.addf %64, %65 : vector<16x32xf32>
    %67 = arith.negf %66 : vector<16x32xf32>
    %68 = math.exp %67 : vector<16x32xf32>
    %cst_41 = arith.constant 1.000000e+00 : f32
    %69 = vector.broadcast %cst_41 : f32 to vector<16x32xf32>
    %70 = arith.addf %69, %68 : vector<16x32xf32>
    %71 = arith.divf %69, %70 : vector<16x32xf32>
    %72 = arith.index_cast %c1_i32 : i32 to index
    %c0_42 = arith.constant 0 : index
    %c0_43 = arith.constant 0 : index
    %73 = vector.load %arg13[%72, %c0_42, %c0_43] : memref<4x16x32xf32, #tpu.memory_space<vmem>>, vector<1x16x32xf32>
    %74 = vector.shape_cast %73 : vector<1x16x32xf32> to vector<16x32xf32>
    %75 = arith.mulf %61, %51 : vector<16x32xf32>
    %cst_44 = arith.constant dense<0.000000e+00> : vector<16x32xf32>
    %76 = tpu.matmul %75, %18, %cst_44 {dimension_numbers = #tpu.dot_dimension_numbers<[1], [0], [0], [1], [0, 0, 1, 1], [], []>} : vector<16x32xf32>, vector<32x32xf32>, vector<16x32xf32> -> vector<16x32xf32>
    %77 = arith.addf %74, %76 : vector<16x32xf32>
    %78 = math.tanh %77 : vector<16x32xf32>
    %79 = arith.mulf %71, %51 : vector<16x32xf32>
    %cst_45 = arith.constant 1.000000e+00 : f32
    %80 = vector.broadcast %cst_45 : f32 to vector<16x32xf32>
    %81 = arith.subf %80, %71 : vector<16x32xf32>
    %82 = arith.mulf %81, %78 : vector<16x32xf32>
    %83 = arith.addf %79, %82 : vector<16x32xf32>
    %c2_i32 = arith.constant 2 : i32
    %84 = arith.index_cast %c2_i32 : i32 to index
    %c0_46 = arith.constant 0 : index
    %c0_47 = arith.constant 0 : index
    %85 = vector.load %arg11[%84, %c0_46, %c0_47] : memref<4x16x32xf32, #tpu.memory_space<vmem>>, vector<1x16x32xf32>
    %86 = vector.shape_cast %85 : vector<1x16x32xf32> to vector<16x32xf32>
    %cst_48 = arith.constant dense<0.000000e+00> : vector<16x32xf32>
    %87 = tpu.matmul %83, %16, %cst_48 {dimension_numbers = #tpu.dot_dimension_numbers<[1], [0], [0], [1], [0, 0, 1, 1], [], []>} : vector<16x32xf32>, vector<32x32xf32>, vector<16x32xf32> -> vector<16x32xf32>
    %88 = arith.addf %86, %87 : vector<16x32xf32>
    %89 = arith.negf %88 : vector<16x32xf32>
    %90 = math.exp %89 : vector<16x32xf32>
    %cst_49 = arith.constant 1.000000e+00 : f32
    %91 = vector.broadcast %cst_49 : f32 to vector<16x32xf32>
    %92 = arith.addf %91, %90 : vector<16x32xf32>
    %93 = arith.divf %91, %92 : vector<16x32xf32>
    %94 = arith.index_cast %c2_i32 : i32 to index
    %c0_50 = arith.constant 0 : index
    %c0_51 = arith.constant 0 : index
    %95 = vector.load %arg12[%94, %c0_50, %c0_51] : memref<4x16x32xf32, #tpu.memory_space<vmem>>, vector<1x16x32xf32>
    %96 = vector.shape_cast %95 : vector<1x16x32xf32> to vector<16x32xf32>
    %cst_52 = arith.constant dense<0.000000e+00> : vector<16x32xf32>
    %97 = tpu.matmul %83, %17, %cst_52 {dimension_numbers = #tpu.dot_dimension_numbers<[1], [0], [0], [1], [0, 0, 1, 1], [], []>} : vector<16x32xf32>, vector<32x32xf32>, vector<16x32xf32> -> vector<16x32xf32>
    %98 = arith.addf %96, %97 : vector<16x32xf32>
    %99 = arith.negf %98 : vector<16x32xf32>
    %100 = math.exp %99 : vector<16x32xf32>
    %cst_53 = arith.constant 1.000000e+00 : f32
    %101 = vector.broadcast %cst_53 : f32 to vector<16x32xf32>
    %102 = arith.addf %101, %100 : vector<16x32xf32>
    %103 = arith.divf %101, %102 : vector<16x32xf32>
    %104 = arith.index_cast %c2_i32 : i32 to index
    %c0_54 = arith.constant 0 : index
    %c0_55 = arith.constant 0 : index
    %105 = vector.load %arg13[%104, %c0_54, %c0_55] : memref<4x16x32xf32, #tpu.memory_space<vmem>>, vector<1x16x32xf32>
    %106 = vector.shape_cast %105 : vector<1x16x32xf32> to vector<16x32xf32>
    %107 = arith.mulf %93, %83 : vector<16x32xf32>
    %cst_56 = arith.constant dense<0.000000e+00> : vector<16x32xf32>
    %108 = tpu.matmul %107, %18, %cst_56 {dimension_numbers = #tpu.dot_dimension_numbers<[1], [0], [0], [1], [0, 0, 1, 1], [], []>} : vector<16x32xf32>, vector<32x32xf32>, vector<16x32xf32> -> vector<16x32xf32>
    %109 = arith.addf %106, %108 : vector<16x32xf32>
    %110 = math.tanh %109 : vector<16x32xf32>
    %111 = arith.mulf %103, %83 : vector<16x32xf32>
    %cst_57 = arith.constant 1.000000e+00 : f32
    %112 = vector.broadcast %cst_57 : f32 to vector<16x32xf32>
    %113 = arith.subf %112, %103 : vector<16x32xf32>
    %114 = arith.mulf %113, %110 : vector<16x32xf32>
    %115 = arith.addf %111, %114 : vector<16x32xf32>
    %c3_i32 = arith.constant 3 : i32
    %116 = arith.index_cast %c3_i32 : i32 to index
    %c0_58 = arith.constant 0 : index
    %c0_59 = arith.constant 0 : index
    %117 = vector.load %arg11[%116, %c0_58, %c0_59] : memref<4x16x32xf32, #tpu.memory_space<vmem>>, vector<1x16x32xf32>
    %118 = vector.shape_cast %117 : vector<1x16x32xf32> to vector<16x32xf32>
    %cst_60 = arith.constant dense<0.000000e+00> : vector<16x32xf32>
    %119 = tpu.matmul %115, %16, %cst_60 {dimension_numbers = #tpu.dot_dimension_numbers<[1], [0], [0], [1], [0, 0, 1, 1], [], []>} : vector<16x32xf32>, vector<32x32xf32>, vector<16x32xf32> -> vector<16x32xf32>
    %120 = arith.addf %118, %119 : vector<16x32xf32>
    %121 = arith.negf %120 : vector<16x32xf32>
    %122 = math.exp %121 : vector<16x32xf32>
    %cst_61 = arith.constant 1.000000e+00 : f32
    %123 = vector.broadcast %cst_61 : f32 to vector<16x32xf32>
    %124 = arith.addf %123, %122 : vector<16x32xf32>
    %125 = arith.divf %123, %124 : vector<16x32xf32>
    %126 = arith.index_cast %c3_i32 : i32 to index
    %c0_62 = arith.constant 0 : index
    %c0_63 = arith.constant 0 : index
    %127 = vector.load %arg12[%126, %c0_62, %c0_63] : memref<4x16x32xf32, #tpu.memory_space<vmem>>, vector<1x16x32xf32>
    %128 = vector.shape_cast %127 : vector<1x16x32xf32> to vector<16x32xf32>
    %cst_64 = arith.constant dense<0.000000e+00> : vector<16x32xf32>
    %129 = tpu.matmul %115, %17, %cst_64 {dimension_numbers = #tpu.dot_dimension_numbers<[1], [0], [0], [1], [0, 0, 1, 1], [], []>} : vector<16x32xf32>, vector<32x32xf32>, vector<16x32xf32> -> vector<16x32xf32>
    %130 = arith.addf %128, %129 : vector<16x32xf32>
    %131 = arith.negf %130 : vector<16x32xf32>
    %132 = math.exp %131 : vector<16x32xf32>
    %cst_65 = arith.constant 1.000000e+00 : f32
    %133 = vector.broadcast %cst_65 : f32 to vector<16x32xf32>
    %134 = arith.addf %133, %132 : vector<16x32xf32>
    %135 = arith.divf %133, %134 : vector<16x32xf32>
    %136 = arith.index_cast %c3_i32 : i32 to index
    %c0_66 = arith.constant 0 : index
    %c0_67 = arith.constant 0 : index
    %137 = vector.load %arg13[%136, %c0_66, %c0_67] : memref<4x16x32xf32, #tpu.memory_space<vmem>>, vector<1x16x32xf32>
    %138 = vector.shape_cast %137 : vector<1x16x32xf32> to vector<16x32xf32>
    %139 = arith.mulf %125, %115 : vector<16x32xf32>
    %cst_68 = arith.constant dense<0.000000e+00> : vector<16x32xf32>
    %140 = tpu.matmul %139, %18, %cst_68 {dimension_numbers = #tpu.dot_dimension_numbers<[1], [0], [0], [1], [0, 0, 1, 1], [], []>} : vector<16x32xf32>, vector<32x32xf32>, vector<16x32xf32> -> vector<16x32xf32>
    %141 = arith.addf %138, %140 : vector<16x32xf32>
    %142 = math.tanh %141 : vector<16x32xf32>
    %143 = arith.mulf %135, %115 : vector<16x32xf32>
    %cst_69 = arith.constant 1.000000e+00 : f32
    %144 = vector.broadcast %cst_69 : f32 to vector<16x32xf32>
    %145 = arith.subf %144, %135 : vector<16x32xf32>
    %146 = arith.mulf %145, %142 : vector<16x32xf32>
    %147 = arith.addf %143, %146 : vector<16x32xf32>
    %c4_i32 = arith.constant 4 : i32
    %c0_70 = arith.constant 0 : index
    %c0_71 = arith.constant 0 : index
    %148 = vector.load %arg10[%c0_70, %c0_71] : memref<16x32xf32, #tpu.memory_space<vmem>>, vector<16x32xf32>
    tpu.vector_store %arg10[%c0_70, %c0_71], %147 {strides = array<i32>} : memref<16x32xf32, #tpu.memory_space<vmem>>, vector<16x32xf32>,
    %c0_72 = arith.constant 0 : index
    %c0_73 = arith.constant 0 : index
    %149 = vector.load %arg7[%c0_72, %c0_73] : memref<32x32xf32, #tpu.memory_space<vmem>>, vector<32x32xf32>
    %cst_74 = arith.constant dense<0.000000e+00> : vector<16x32xf32>
    %150 = tpu.matmul %147, %149, %cst_74 {dimension_numbers = #tpu.dot_dimension_numbers<[1], [0], [0], [1], [0, 0, 1, 1], [], []>} : vector<16x32xf32>, vector<32x32xf32>, vector<16x32xf32> -> vector<16x32xf32>
    %c0_75 = arith.constant 0 : index
    %c0_76 = arith.constant 0 : index
    %151 = vector.load %arg8[%c0_75, %c0_76] : memref<1x32xf32, #tpu.memory_space<vmem>>, vector<1x32xf32>
    %152 = vector.broadcast %151 : vector<1x32xf32> to vector<16x32xf32>
    %153 = arith.addf %150, %152 : vector<16x32xf32>
    %154 = arith.negf %153 : vector<16x32xf32>
    %155 = math.exp %154 : vector<16x32xf32>
    %cst_77 = arith.constant 1.000000e+00 : f32
    %156 = vector.broadcast %cst_77 : f32 to vector<16x32xf32>
    %157 = arith.addf %156, %155 : vector<16x32xf32>
    %158 = arith.divf %156, %157 : vector<16x32xf32>
    %c0_78 = arith.constant 0 : index
    %c0_79 = arith.constant 0 : index
    %159 = vector.load %arg9[%c0_78, %c0_79] : memref<16x32xf32, #tpu.memory_space<vmem>>, vector<16x32xf32>
    tpu.vector_store %arg9[%c0_78, %c0_79], %158 {strides = array<i32>} : memref<16x32xf32, #tpu.memory_space<vmem>>, vector<16x32xf32>,
    return
  }
  func.func @transform_0(%arg0: i32) -> (i32, i32, i32) {
    %c0_i32 = arith.constant 0 : i32
    %c0_i32_0 = arith.constant 0 : i32
    %c0_i32_1 = arith.constant 0 : i32
    return %c0_i32, %arg0, %c0_i32_0 : i32, i32, i32
  }
  func.func @transform_1(%arg0: i32) -> (i32, i32) {
    %c0_i32 = arith.constant 0 : i32
    %c0_i32_0 = arith.constant 0 : i32
    %c0_i32_1 = arith.constant 0 : i32
    return %c0_i32, %c0_i32_0 : i32, i32
  }
  func.func @transform_2(%arg0: i32) -> (i32, i32) {
    %c0_i32 = arith.constant 0 : i32
    %c0_i32_0 = arith.constant 0 : i32
    %c0_i32_1 = arith.constant 0 : i32
    return %c0_i32, %c0_i32_0 : i32, i32
  }
  func.func @transform_3(%arg0: i32) -> (i32, i32) {
    %c0_i32 = arith.constant 0 : i32
    %c0_i32_0 = arith.constant 0 : i32
    %c0_i32_1 = arith.constant 0 : i32
    return %c0_i32, %c0_i32_0 : i32, i32
  }
  func.func @transform_4(%arg0: i32) -> (i32, i32) {
    %c0_i32 = arith.constant 0 : i32
    %c0_i32_0 = arith.constant 0 : i32
    %c0_i32_1 = arith.constant 0 : i32
    return %c0_i32, %c0_i32_0 : i32, i32
  }
  func.func @transform_5(%arg0: i32) -> (i32, i32) {
    %c0_i32 = arith.constant 0 : i32
    %c0_i32_0 = arith.constant 0 : i32
    %c0_i32_1 = arith.constant 0 : i32
    return %c0_i32, %c0_i32_0 : i32, i32
  }
  func.func @transform_6(%arg0: i32) -> (i32, i32) {
    %c0_i32 = arith.constant 0 : i32
    %c0_i32_0 = arith.constant 0 : i32
    %c0_i32_1 = arith.constant 0 : i32
    return %c0_i32, %c0_i32_0 : i32, i32
  }
  func.func @transform_7(%arg0: i32) -> (i32, i32) {
    %c0_i32 = arith.constant 0 : i32
    %c0_i32_0 = arith.constant 0 : i32
    %c0_i32_1 = arith.constant 0 : i32
    return %c0_i32, %c0_i32_0 : i32, i32
  }
  func.func @transform_8(%arg0: i32) -> (i32, i32) {
    %c0_i32 = arith.constant 0 : i32
    %c0_i32_0 = arith.constant 0 : i32
    return %arg0, %c0_i32 : i32, i32
  }
  func.func @transform_9(%arg0: i32) -> (i32, i32) {
    %c0_i32 = arith.constant 0 : i32
    %c0_i32_0 = arith.constant 0 : i32
    return %arg0, %c0_i32 : i32, i32
  }
}

</mosaic_0001>

<bundles_post_ra>
// kernel: tpu_custom_call.1
= control target key start
LH: loop header
LB: loop body
LE: loop exit
PB: predicated region body
PF: predicated region fallthrough
CT: control target
= control target key end

     0   :  { %15 = vsyncpa [#allocation6], 0  ;;  %s2746_s0 = inlined_call_operand.hbm [shape: f32[4,16,32], index: 0, kind: input, shape index: {}]   ;;  %s2747_s1 = inlined_call_operand.hbm [shape: f32[32,96], index: 1, kind: input, shape index: {}]   ;;  %s2748_s2 = inlined_call_operand.vmem [shape: f32[1,96], index: 2, kind: input, shape index: {}]   ;;  %s2749_s3 = inlined_call_operand.hbm [shape: f32[32,32], index: 3, kind: input, shape index: {}]   ;;  %s2750_s4 = inlined_call_operand.hbm [shape: f32[32,32], index: 4, kind: input, shape index: {}]   ;;  %s2751_s5 = inlined_call_operand.hbm [shape: f32[32,32], index: 5, kind: input, shape index: {}]   ;;  %s2752_s6 = inlined_call_operand.hbm [shape: f32[32,32], index: 6, kind: input, shape index: {}]   ;;  %s2753_s7 = inlined_call_operand.vmem [shape: f32[1,32], index: 7, kind: input, shape index: {}]   ;;  %s2754_s8 = inlined_call_operand.hbm [shape: f32[16,32], index: 8, kind: output, shape index: {0}]   ;;  %s2755_s9 = inlined_call_operand.hbm [shape: f32[16,32], index: 9, kind: output, shape index: {1}]  }
   0x1   :  { %16 = vsyncpa [#allocation9], 0 }
   0x2   :  { %17 = vsyncpa [#allocation12], 0 }
   0x3   :  { %18 = vsyncpa [#allocation15], 0 }
   0x4   :  { %19 = vsyncpa [#allocation7], 0 }
   0x5   :  { %20 = vsyncpa [#allocation18], 0  ;;  %s2350_s30 = smov [#allocation8]   ;;  %s2351_s11 = smov [#allocation11]  }
   0x6   :  { %s38_s10 = sshll.u32 %s2350_s30, 4  ;;  %s64_s12 = sshll.u32 %s2351_s11, 4  ;;  %s39_s10 = int_to_ptr.vmem [resolvable:$true] %s38_s10  ;;  %s2413_s12 = int_to_ptr.vmem [resolvable:$true] %s64_s12 }
   0x7   :  { %s2162_s15 = scalar_lea.hbm %s2747_s1, 512 }
   0x8   :  { %p2163_p0 = scmp.ne.s32.totalorder %s2747_s1, %s2162_s15  ;;  %p2166_p1 = scmp.lt.u32.totalorder %s2162_s15, %s2747_s1 }
   0xa   :  { %p2168_p2 = pnand %p2166_p1, %p2163_p0 }
   0xc   :  { %2171 = shalt.err (!%p2168_p2)
}
   0xd   :  { %s2172_s20 = scalar_lea.vmem %s39_s10, 512  ;;  %p2177_p4 = scmp.lt.s32.totalorder %s39_s10, %s39_s10 }
   0xe   :  { %p2173_p3 = scmp.ne.s32.totalorder %s39_s10, %s2172_s20  ;;  %p2178_p5 = scmp.lt.s32.totalorder %s2172_s20, %s2172_s20 }
  0x10   :  { %p2179_p6 = por %p2178_p5, %p2177_p4 }
  0x12   :  { %p2180_p7 = pnand %p2179_p6, %p2173_p3 }
  0x14   :  { %2183 = shalt.err (!%p2180_p7)
}
  0x15   :  { %s2352_s21 = smov 128   ;;  %s2353_s22 = smov 8  }
  0x16   :  { %44 = dma.hbm_to_vmem [thread:$0]  %s2747_s1, 512, %s39_s10, [#allocation9], %s2352_s21, %s2352_s21, %s2353_s22  }
  0x17   :  { %s2184_s27 = scalar_lea.hbm %s2750_s4, 512 }
  0x18   :  { %p2185_p8 = scmp.ne.s32.totalorder %s2750_s4, %s2184_s27  ;;  %p2188_p9 = scmp.lt.u32.totalorder %s2184_s27, %s2750_s4 }
  0x1a   :  { %p2190_p10 = pnand %p2188_p9, %p2185_p8 }
  0x1c   :  { %2193 = shalt.err (!%p2190_p10)
}
  0x1d   :  { %s2194_s13 = scalar_lea.vmem %s2413_s12, 512  ;;  %p2199_p12 = scmp.lt.s32.totalorder %s2413_s12, %s2413_s12 }
  0x1e   :  { %p2195_p11 = scmp.ne.s32.totalorder %s2413_s12, %s2194_s13  ;;  %p2200_p13 = scmp.lt.s32.totalorder %s2194_s13, %s2194_s13 }
  0x20   :  { %p2201_p0 = por %p2200_p13, %p2199_p12 }
  0x22   :  { %p2202_p1 = pnand %p2201_p0, %p2195_p11 }
  0x24   :  { %2205 = shalt.err (!%p2202_p1)
}
  0x25   :  { %70 = dma.hbm_to_vmem [thread:$0]  %s2750_s4, 512, %s2413_s12, [#allocation12], %s2352_s21, %s2352_s21, %s2353_s22  }
  0x26   :  { %s2354_s14 = smov [#allocation5]   ;;  %s2355_s16 = smov [#allocation10]  }
  0x27   :  { %s26_s15 = sshll.u32 %s2354_s14, 4  ;;  %s52_s17 = sshll.u32 %s2355_s16, 4  ;;  %s27_s15 = int_to_ptr.vmem [resolvable:$true] %s26_s15  ;;  %s2450_s17 = int_to_ptr.vmem [resolvable:$true] %s52_s17 }
  0x28   :  { %s2206_s20 = scalar_lea.hbm %s2746_s0, 1024 }
  0x29   :  { %p2207_p2 = scmp.ne.s32.totalorder %s2746_s0, %s2206_s20  ;;  %p2210_p3 = scmp.lt.u32.totalorder %s2206_s20, %s2746_s0 }
  0x2b   :  { %p2212_p4 = pnand %p2210_p3, %p2207_p2 }
  0x2d   :  { %2215 = shalt.err (!%p2212_p4)
}
  0x2e   :  { %s2216_s4 = scalar_lea.vmem %s27_s15, 1024  ;;  %p2221_p6 = scmp.lt.s32.totalorder %s27_s15, %s27_s15 }
  0x2f   :  { %p2217_p5 = scmp.ne.s32.totalorder %s27_s15, %s2216_s4  ;;  %p2222_p7 = scmp.lt.s32.totalorder %s2216_s4, %s2216_s4 }
  0x31   :  { %p2223_p8 = por %p2222_p7, %p2221_p6 }
  0x33   :  { %p2224_p9 = pnand %p2223_p8, %p2217_p5 }
  0x35   :  { %2227 = shalt.err (!%p2224_p9)
}
  0x36   :  { %32 = dma.hbm_to_vmem [thread:$0]  %s2746_s0, 1024, %s27_s15, [#allocation6], %s2352_s21, %s2352_s21, %s2353_s22  }
  0x37   :  { %s2228_s30 = scalar_lea.hbm %s2749_s3, 512 }
  0x38   :  { %p2229_p10 = scmp.ne.s32.totalorder %s2749_s3, %s2228_s30  ;;  %p2232_p11 = scmp.lt.u32.totalorder %s2228_s30, %s2749_s3 }
  0x3a   :  { %p2234_p12 = pnand %p2232_p11, %p2229_p10 }
  0x3c   :  { %2237 = shalt.err (!%p2234_p12)
}
  0x3d   :  { %s2238_s14 = scalar_lea.vmem %s2450_s17, 512  ;;  %p2243_p0 = scmp.lt.s32.totalorder %s2450_s17, %s2450_s17 }
  0x3e   :  { %p2239_p13 = scmp.ne.s32.totalorder %s2450_s17, %s2238_s14  ;;  %p2244_p1 = scmp.lt.s32.totalorder %s2238_s14, %s2238_s14 }
  0x40   :  { %p2245_p2 = por %p2244_p1, %p2243_p0 }
  0x42   :  { %p2246_p3 = pnand %p2245_p2, %p2239_p13 }
  0x44   :  { %2249 = shalt.err (!%p2246_p3)
}
  0x45   :  { %58 = dma.hbm_to_vmem [thread:$0]  %s2749_s3, 512, %s2450_s17, [#allocation9], %s2352_s21, %s2352_s21, %s2353_s22  }
  0x46   :  { %s2356_s16 = smov [#allocation13]   ;;  %s2357_s19 = smov [#allocation14]  }
  0x47   :  { %s76_s18 = sshll.u32 %s2356_s16, 4  ;;  %s88_s20 = sshll.u32 %s2357_s19, 4  ;;  %s77_s18 = int_to_ptr.vmem [resolvable:$true] %s76_s18  ;;  %s2487_s20 = int_to_ptr.vmem [resolvable:$true] %s88_s20 }
  0x48   :  { %s2250_s25 = scalar_lea.hbm %s2751_s5, 512 }
  0x49   :  { %p2251_p4 = scmp.ne.s32.totalorder %s2751_s5, %s2250_s25  ;;  %p2254_p5 = scmp.lt.u32.totalorder %s2250_s25, %s2751_s5 }
  0x4b   :  { %p2256_p6 = pnand %p2254_p5, %p2251_p4 }
  0x4d   :  { %2259 = shalt.err (!%p2256_p6)
}
  0x4e   :  { %s2260_s3 = scalar_lea.vmem %s77_s18, 512  ;;  %p2265_p8 = scmp.lt.s32.totalorder %s77_s18, %s77_s18 }
  0x4f   :  { %p2261_p7 = scmp.ne.s32.totalorder %s77_s18, %s2260_s3  ;;  %p2266_p9 = scmp.lt.s32.totalorder %s2260_s3, %s2260_s3 }
  0x51   :  { %p2267_p10 = por %p2266_p9, %p2265_p8 }
  0x53   :  { %p2268_p11 = pnand %p2267_p10, %p2261_p7 }
  0x55   :  { %2271 = shalt.err (!%p2268_p11)
}
  0x56   :  { %82 = dma.hbm_to_vmem [thread:$0]  %s2751_s5, 512, %s77_s18, [#allocation12], %s2352_s21, %s2352_s21, %s2353_s22  }
  0x57   :  { %s2272_s11 = scalar_lea.hbm %s2752_s6, 512 }
  0x58   :  { %p2273_p12 = scmp.ne.s32.totalorder %s2752_s6, %s2272_s11  ;;  %p2276_p13 = scmp.lt.u32.totalorder %s2272_s11, %s2752_s6 }
  0x5a   :  { %p2278_p0 = pnand %p2276_p13, %p2273_p12 }
  0x5c   :  { %2281 = shalt.err (!%p2278_p0)
}
  0x5d   :  { %s2282_s0 = scalar_lea.vmem %s2487_s20, 512  ;;  %p2287_p2 = scmp.lt.s32.totalorder %s2487_s20, %s2487_s20 }
  0x5e   :  { %p2283_p1 = scmp.ne.s32.totalorder %s2487_s20, %s2282_s0  ;;  %p2288_p3 = scmp.lt.s32.totalorder %s2282_s0, %s2282_s0 }
  0x60   :  { %p2289_p4 = por %p2288_p3, %p2287_p2 }
  0x62   :  { %p2290_p5 = pnand %p2289_p4, %p2283_p1 }
  0x64   :  { %2293 = shalt.err (!%p2290_p5)
}
  0x65   :  { %94 = dma.hbm_to_vmem [thread:$0]  %s2752_s6, 512, %s2487_s20, [#allocation15], %s2352_s21, %s2352_s21, %s2353_s22  }
  0x66   :  { %2338 = dma.done.wait [#allocation6], 1024  }
  0x67   :  { %2339 = vsyncadd [#allocation6], 4294966272 }
  0x68   :  { %2340 = dma.done.wait [#allocation9], 1024  }
  0x69   :  { %2341 = vsyncadd [#allocation9], 4294966272 }
  0x6a   :  { %2342 = dma.done.wait [#allocation12], 1024  }
  0x6b   :  { %2343 = vsyncadd [#allocation12], 4294966272 }
  0x6c   :  { %2344 = dma.done.wait [#allocation15], 512  }
  0x6d   :  { %2345 = vsyncadd [#allocation15], 4294966784  ;;  %v2358_v0 = vmov 0.0   ;;  %vm134_vm0 = vcmask 261120   ;;  %v123_v1 = vld [vmem:[#allocation8] sm:$0xff]  ;;  %v124_v2 = vld [vmem:[#allocation8 + $0x8] sm:$0xff] }
  0x6e   :  { %1814 = vmatprep.mubr.f32.mxu1 %v2358_v0  ;;  %v125_v3 = vld [vmem:[#allocation8 + $0x10] sm:$0xff]  ;;  %v1949_v4 = vpack.c.bf16 %v124_v2, %v123_v1  ;;  %v126_v5 = vld [vmem:[#allocation8 + $0x18] sm:$0xff]  ;;  %v115_v6 = vld [vmem:[#allocation5] sm:$0xff]  ;;  %s2359_s18 = smov 64   ;;  %s2360_s19 = smov 96  }
  0x6f   :  { %v1953_v7 = vpack.c.bf16 %v126_v5, %v125_v3  ;;  %1794 = vmatprep.mubr.msk.f32.mxu0 %vm134_vm0, %v115_v6  ;;  %v344_v8 = vld [vmem:[#allocation10] sm:$0xff]  ;;  %v345_v9 = vld [vmem:[#allocation10 + $0x8] sm:$0xff]  ;;  %v346_v10 = vld [vmem:[#allocation10 + $0x10] sm:$0xff] }
  0x70   :  { %1950 = vmatprep.subr.bf16.mxu0 %v1949_v4  ;;  %v2525_v11 = vpack.c.bf16 %v345_v9, %v344_v8  ;;  %v347_v12 = vld [vmem:[#allocation10 + $0x18] sm:$0xff]  ;;  %v348_v14 = vld [vmem:[#allocation11] sm:$0xff]  ;;  %v349_v15 = vld [vmem:[#allocation11 + $0x8] sm:$0xff] }
  0x71   :  { %1952 = vmatpush3.bf16.msra.mxu0 %v1949_v4  ;;  %v2527_v13 = vpack.c.bf16 %v347_v12, %v346_v10  ;;  %v2532_v16 = vpack.c.bf16 %v349_v15, %v348_v14  ;;  %v116_v17 = vld [vmem:[#allocation5 + $0x8] sm:$0xff]  ;;  %v350_v18 = vld [vmem:[#allocation11 + $0x10] sm:$0xff]  ;;  %v351_v19 = vld [vmem:[#allocation11 + $0x18] sm:$0xff] }
  0x72   :  { %1954 = vmatprep.subr.bf16.mxu0 %v1953_v7  ;;  %1958 = vmatprep.subr.bf16.mxu1 %v2525_v11  ;;  %v2537_v20 = vpack.c.bf16 %v351_v19, %v350_v18  ;;  %v117_v21 = vld [vmem:[#allocation5 + $0x10] sm:$0xff]  ;;  %v118_v22 = vld [vmem:[#allocation5 + $0x18] sm:$0xff]  ;;  %v119_v23 = vld [vmem:[#allocation5 + $0x20] sm:$0xff] }
  0x73   :  { %1960 = vmatpush3.bf16.msra.mxu1 %v2525_v11  ;;  %v120_v24 = vld [vmem:[#allocation5 + $0x28] sm:$0xff]  ;;  %v352_v25 = vld [vmem:[#allocation13] sm:$0xff]  ;;  %v121_v27 = vld [vmem:[#allocation5 + $0x30] sm:$0xff] }
  0x74   :  { %1962 = vmatprep.subr.bf16.mxu1 %v2527_v13  ;;  %v353_v26 = vld [vmem:[#allocation13 + $0x8] sm:$0xff]  ;;  %v122_v29 = vld [vmem:[#allocation5 + $0x38] sm:$0xff]  ;;  %v354_v30 = vld [vmem:[#allocation13 + $0x10] sm:$0xff] }
  0x75   :  { %1956 = vmatpush3.bf16.msra.mxu0 %v1953_v7  ;;  %v2550_v28 = vpack.c.bf16 %v353_v26, %v352_v25  ;;  %v355_v31 = vld [vmem:[#allocation13 + $0x18] sm:$0xff]  ;;  %v2565_v33 = vld [vmem:[%s2748_s2] ss:$0 sm:$0xff]  ;;  %s2361_s2 = smov [#allocation17]  }
  0x76   :  { %v2557_v32 = vpack.c.bf16 %v355_v31, %v354_v30  ;;  %s1627_s20 = sshll.u32 %s2361_s2, 4  ;;  %s1628_s20 = int_to_ptr.vmem [resolvable:$true] %s1627_s20 }
  0x77   :  { %1964 = vmatpush3.bf16.msra.mxu1 %v2527_v13  ;;  %1974 = vmatprep.subr.bf16.mxu0 %v2550_v28  ;;  %s2294_s23 = scalar_lea.vmem %s1628_s20, 256  ;;  %p2299_p7 = scmp.lt.s32.totalorder %s1628_s20, %s1628_s20 }
  0x78   :  { %1795 = vmatmul.mubr.msk.f32.vlgmr.msra.gmra.mrb[0].mxu0 %vm134_vm0, %v116_v17  ;;  %1966 = vmatprep.subr.bf16.mxu1 %v2532_v16  ;;  %p2295_p6 = scmp.ne.s32.totalorder %s1628_s20, %s2294_s23  ;;  %p2300_p8 = scmp.lt.s32.totalorder %s2294_s23, %s2294_s23 }
  0x79   :  { %1797 = vmatprep.mubr.msk.f32.mxu0 %vm134_vm0, %v117_v21  ;;  %1976 = vmatpush3.bf16.msra.mxu0 %v2550_v28 }
  0x7a   :  { %1815 = vmatmul.mubr.f32.vlgmr.msra.gmra.mrb[0].mxu1 %v2358_v0  ;;  %1978 = vmatprep.subr.bf16.mxu0 %v2557_v32  ;;  %p2301_p9 = por %p2300_p8, %p2299_p7 }
  0x7b   :  { %1968 = vmatpush3.bf16.msra.mxu1 %v2532_v16  ;;  %1825 = vmatprep.mubr.f32.mxu1 %v2358_v0 }
  0x7c   :  { %1970 = vmatprep.subr.bf16.mxu1 %v2537_v20  ;;  %1798 = vmatmul.mubr.msk.f32.gmra.mrb[2].mxu0 %vm134_vm0, %v118_v22  ;;  %p2302_p10 = pnand %p2301_p9, %p2295_p6 }
  0x7d   :  { %1800 = vmatprep.mubr.msk.f32.mxu0 %vm134_vm0, %v119_v23  ;;  %1980 = vmatpush3.bf16.msra.mxu0 %v2557_v32 }
  0x7e   :  { %1990 = vmatprep.subr.bf16.mxu0 %v2532_v16 }
  0x7f   :  { %1972 = vmatpush3.bf16.msra.mxu1 %v2537_v20 }
  0x80   :  { %1982 = vmatprep.subr.bf16.mxu1 %v2525_v11  ;;  %1801 = vmatmul.mubr.msk.f32.gmra.mrb[4].mxu0 %vm134_vm0, %v120_v24 }
  0x81   :  { %1803 = vmatprep.mubr.msk.f32.mxu0 %vm134_vm0, %v121_v27 }
  0x82   :  { %1826 = vmatmul.mubr.f32.vlgmr.msra.gmra.mrb[2].mxu1 %v2358_v0 }
  0x83   :  { %1984 = vmatpush3.bf16.msra.mxu1 %v2525_v11 }
  0x84   :  { %1986 = vmatprep.subr.bf16.mxu1 %v2527_v13  ;;  %1804 = vmatmul.mubr.msk.f32.gmra.mrb[6].mxu0 %vm134_vm0, %v122_v29 }
  0x87   :  { %1988 = vmatpush3.bf16.msra.mxu1 %v2527_v13 }
  0x88   :  { %1998 = vmatprep.subr.bf16.mxu1 %v2550_v28 }
 0x14b   :  { %v1796_v34 = vpop.f32.mrb[0].mxu0 }
 0x14c   :  { %v231_v35 = vadd.f32 %v1796_v34, %v2565_v33  ;;  %v225_v36 = vpop.f32.mrb[1].mxu0 }
 0x14d   :  { %v226_v37 = vadd.f32 %v2565_v33, %v225_v36  ;;  %v1816_v38 = vpop.f32.mrb[0].mxu1 }
 0x14e   :  { %265 = vst.msk [vmem:[#allocation2 + $0x8] sm:$0xff] %vm134_vm0, %v231_v35  ;;  %v427_v39 = vpop.f32.mrb[1].mxu1 }
 0x14f   :  { %264 = vst.msk [vmem:[#allocation2] sm:$0xff] %vm134_vm0, %v226_v37  ;;  %312 = vrot.lane.b32.xlu1 %v226_v37, %s2359_s18  ;;  %280 = vrot.lane.b32.xlu0 %v226_v37, %s2360_s19  ;;  %v1799_v56 = vpop.f32.mrb[2].mxu0 }
 0x150   :  { %v241_v57 = vadd.f32 %v1799_v56, %v2565_v33  ;;  %v235_v58 = vpop.f32.mrb[3].mxu0 }
 0x151   :  { %v236_v59 = vadd.f32 %v2565_v33, %v235_v58 }
 0x152   :  { %267 = vst.msk [vmem:[#allocation2 + $0x18] sm:$0xff] %vm134_vm0, %v241_v57 }
 0x153   :  { %314 = vrot.lane.b32.xlu1 %v231_v35, %s2359_s18  ;;  %282 = vrot.lane.b32.xlu0 %v231_v35, %s2360_s19  ;;  %266 = vst.msk [vmem:[#allocation2 + $0x10] sm:$0xff] %vm134_vm0, %v236_v59  ;;  %v1802_v60 = vpop.f32.mrb[4].mxu0 }
 0x154   :  { %v251_v61 = vadd.f32 %v1802_v60, %v2565_v33  ;;  %v245_v62 = vpop.f32.mrb[5].mxu0 }
 0x155   :  { %v357_v40 = vld [vmem:[#allocation2 + $0x8] sm:$0xff]  ;;  %v2575_v41 = vpop.f32.mrb[2].mxu1  ;;  %v246_v63 = vadd.f32 %v2565_v33, %v245_v62 }
 0x156   :  { %v437_v42 = vadd.f32 %v1816_v38, %v357_v40  ;;  %v356_v43 = vld [vmem:[#allocation2] sm:$0xff]  ;;  %v2577_v44 = vpop.f32.mrb[3].mxu1  ;;  %269 = vst.msk [vmem:[#allocation2 + $0x28] sm:$0xff] %vm134_vm0, %v251_v61 }
 0x157   :  { %v436_v45 = vadd.f32 %v427_v39, %v356_v43  ;;  %286 = vrot.lane.b32.xlu1 %v241_v57, %s2360_s19  ;;  %284 = vrot.lane.b32.xlu0 %v236_v59, %s2360_s19  ;;  %268 = vst.msk [vmem:[#allocation2 + $0x20] sm:$0xff] %vm134_vm0, %v246_v63  ;;  %v1805_v0 = vpop.f32.mrb[6].mxu0 }
 0x158   :  { %v1656_v46 = vmul.f32 -1.442695, %v437_v42  ;;  %v261_v3 = vadd.f32 %v1805_v0, %v2565_v33  ;;  %v255_v4 = vpop.f32.mrb[7].mxu0 }
 0x159   :  { %v1655_v47 = vmul.f32 -1.442695, %v436_v45  ;;  %v256_v5 = vadd.f32 %v2565_v33, %v255_v4 }
 0x15a   :  { %2074 = vpow2.f32 %v1656_v46  ;;  %271 = vst.msk [vmem:[#allocation2 + $0x38] sm:$0xff] %vm134_vm0, %v261_v3  ;;  %v639_v58 = vld [vmem:[#allocation2 + $0x10] sm:$0xff] }
 0x15b   :  { %2076 = vpow2.f32 %v1655_v47  ;;  %318 = vrot.lane.b32.xlu1 %v241_v57, %s2359_s18  ;;  %316 = vrot.lane.b32.xlu0 %v236_v59, %s2359_s18  ;;  %270 = vst.msk [vmem:[#allocation2 + $0x30] sm:$0xff] %vm134_vm0, %v256_v5 }
 0x15f   :  { %290 = vrot.lane.b32.xlu1 %v251_v61, %s2360_s19  ;;  %288 = vrot.lane.b32.xlu0 %v246_v63, %s2360_s19 }
 0x163   :  { %322 = vrot.lane.b32.xlu1 %v251_v61, %s2359_s18  ;;  %320 = vrot.lane.b32.xlu0 %v246_v63, %s2359_s18 }
 0x164   :  { %v2075_v48 = vpop.eup %2074 }
 0x165   :  { %v2077_v49 = vpop.eup %2076  ;;  %v445_v50 = vadd.f32 1.0, %v2075_v48 }
 0x166   :  { %v444_v51 = vadd.f32 1.0, %v2077_v49 }
 0x167   :  { %2078 = vrcp.f32 %v445_v50  ;;  %294 = vrot.lane.b32.xlu1 %v261_v3, %s2360_s19  ;;  %292 = vrot.lane.b32.xlu0 %v256_v5, %s2360_s19 }
 0x168   :  { %2080 = vrcp.f32 %v444_v51 }
 0x16b   :  { %326 = vrot.lane.b32.xlu1 %v261_v3, %s2359_s18  ;;  %324 = vrot.lane.b32.xlu0 %v256_v5, %s2359_s18 }
 0x171   :  { %v2079_v52 = vpop.eup %2078 }
 0x172   :  { %v2081_v53 = vpop.eup %2080  ;;  %v544_v55 = vmul.f32 0.0, %v2079_v52 }
 0x173   :  { %v543_v54 = vmul.f32 0.0, %v2081_v53 }
 0x175   :  { %1836 = vmatprep.mubr.msk.f32.mxu0 %vm134_vm0, %v543_v54  ;;  %v640_v54 = vld [vmem:[#allocation2 + $0x18] sm:$0xff] }
 0x176   :  { %1837 = vmatmul.mubr.msk.f32.vlgmr.msra.gmra.mrb[8].mxu0 %vm134_vm0, %v544_v55 }
 0x177   :  { %1992 = vmatpush3.bf16.msra.mxu0 %v2532_v16 }
 0x178   :  { %1994 = vmatprep.subr.bf16.mxu0 %v2537_v20 }
 0x17b   :  { %1996 = vmatpush3.bf16.msra.mxu0 %v2537_v20 }
 0x17c   :  { %2006 = vmatprep.subr.bf16.mxu0 %v2525_v11 }
 0x1c1   :  { %v313_v1 = vpop.permute.xlu1 %312  ;;  %v281_v2 = vpop.permute.xlu0 %280 }
 0x1c2   :  { %336 = vst.msk [vmem:[#allocation4] sm:$0xff] %vm134_vm0, %v313_v1  ;;  %304 = vst.msk [vmem:[#allocation3] sm:$0xff] %vm134_vm0, %v281_v2 }
 0x1c5   :  { %v315_v6 = vpop.permute.xlu1 %314  ;;  %v283_v7 = vpop.permute.xlu0 %282 }
 0x1c6   :  { %337 = vst.msk [vmem:[#allocation4 + $0x8] sm:$0xff] %vm134_vm0, %v315_v6  ;;  %305 = vst.msk [vmem:[#allocation3 + $0x8] sm:$0xff] %vm134_vm0, %v283_v7 }
 0x1c9   :  { %v287_v8 = vpop.permute.xlu1 %286  ;;  %v285_v9 = vpop.permute.xlu0 %284  ;;  %v450_v15 = vld [vmem:[#allocation3] sm:$0xff] }
 0x1ca   :  { %307 = vst.msk [vmem:[#allocation3 + $0x18] sm:$0xff] %vm134_vm0, %v287_v8  ;;  %306 = vst.msk [vmem:[#allocation3 + $0x10] sm:$0xff] %vm134_vm0, %v285_v9  ;;  %v527_v21 = vadd.f32 %v2577_v44, %v450_v15  ;;  %v541_v39 = vld [vmem:[#allocation4] sm:$0xff] }
 0x1cc   :  { %v1657_v25 = vmul.f32 -1.442695, %v527_v21 }
 0x1cd   :  { %v319_v10 = vpop.permute.xlu1 %318  ;;  %v317_v12 = vpop.permute.xlu0 %316  ;;  %v451_v14 = vld [vmem:[#allocation3 + $0x8] sm:$0xff] }
 0x1ce   :  { %339 = vst.msk [vmem:[#allocation4 + $0x18] sm:$0xff] %vm134_vm0, %v319_v10  ;;  %338 = vst.msk [vmem:[#allocation4 + $0x10] sm:$0xff] %vm134_vm0, %v317_v12  ;;  %v528_v19 = vadd.f32 %v2575_v41, %v451_v14  ;;  %v542_v36 = vld [vmem:[#allocation4 + $0x8] sm:$0xff] }
 0x1d0   :  { %v1658_v24 = vmul.f32 -1.442695, %v528_v19 }
 0x1d1   :  { %v291_v17 = vpop.permute.xlu1 %290  ;;  %v289_v18 = vpop.permute.xlu0 %288  ;;  %v738_v8 = vld [vmem:[#allocation3 + $0x18] sm:$0xff]  ;;  %v737_v10 = vld [vmem:[#allocation3 + $0x10] sm:$0xff] }
 0x1d2   :  { %309 = vst.msk [vmem:[#allocation3 + $0x28] sm:$0xff] %vm134_vm0, %v291_v17  ;;  %308 = vst.msk [vmem:[#allocation3 + $0x20] sm:$0xff] %vm134_vm0, %v289_v18  ;;  %2082 = vpow2.f32 %v1658_v24 }
 0x1d3   :  { %2084 = vpow2.f32 %v1657_v25 }
 0x1d5   :  { %v323_v22 = vpop.permute.xlu1 %322  ;;  %v321_v23 = vpop.permute.xlu0 %320  ;;  %v829_v25 = vld [vmem:[#allocation4 + $0x10] sm:$0xff] }
 0x1d6   :  { %341 = vst.msk [vmem:[#allocation4 + $0x28] sm:$0xff] %vm134_vm0, %v323_v22  ;;  %340 = vst.msk [vmem:[#allocation4 + $0x20] sm:$0xff] %vm134_vm0, %v321_v23  ;;  %v830_v22 = vld [vmem:[#allocation4 + $0x18] sm:$0xff] }
 0x1d9   :  { %v295_v26 = vpop.permute.xlu1 %294  ;;  %v293_v27 = vpop.permute.xlu0 %292 }
 0x1da   :  { %311 = vst.msk [vmem:[#allocation3 + $0x38] sm:$0xff] %vm134_vm0, %v295_v26  ;;  %310 = vst.msk [vmem:[#allocation3 + $0x30] sm:$0xff] %vm134_vm0, %v293_v27 }
 0x1dc   :  { %v2083_v31 = vpop.eup %2082 }
 0x1dd   :  { %v327_v29 = vpop.permute.xlu1 %326  ;;  %v325_v30 = vpop.permute.xlu0 %324  ;;  %v536_v34 = vadd.f32 1.0, %v2083_v31 }
 0x1de   :  { %343 = vst.msk [vmem:[#allocation4 + $0x38] sm:$0xff] %vm134_vm0, %v327_v29  ;;  %342 = vst.msk [vmem:[#allocation4 + $0x30] sm:$0xff] %vm134_vm0, %v325_v30  ;;  %v2085_v33 = vpop.eup %2084 }
 0x1df   :  { %v535_v35 = vadd.f32 1.0, %v2085_v33  ;;  %2086 = vrcp.f32 %v536_v34 }
 0x1e1   :  { %2088 = vrcp.f32 %v535_v35 }
 0x1e9   :  { %v2087_v42 = vpop.eup %2086 }
 0x1ea   :  { %v633_v44 = vsub.f32 1.0, %v2087_v42  ;;  %v631_v49 = vmul.f32 0.0, %v2087_v42  ;;  %v928_v42 = vld [vmem:[#allocation2 + $0x28] sm:$0xff] }
 0x1eb   :  { %v2089_v43 = vpop.eup %2088 }
 0x1ec   :  { %v632_v46 = vsub.f32 1.0, %v2089_v43  ;;  %v630_v50 = vmul.f32 0.0, %v2089_v43 }
 0x249   :  { %v1838_v37 = vpop.f32.mrb[8].mxu0 }
 0x24a   :  { %v627_v38 = vadd.f32 %v1838_v37, %v542_v36  ;;  %v617_v40 = vpop.f32.mrb[9].mxu0 }
 0x24b   :  { %v626_v41 = vadd.f32 %v617_v40, %v541_v39 }
 0x24c   :  { %2090 = vtanh.f32 %v627_v38 }
 0x24d   :  { %2092 = vtanh.f32 %v626_v41 }
 0x256   :  { %v2091_v45 = vpop.eup %2090 }
 0x257   :  { %v2093_v47 = vpop.eup %2092  ;;  %v635_v48 = vmul.f32 %v2091_v45, %v633_v44 }
 0x258   :  { %v634_v51 = vmul.f32 %v2093_v47, %v632_v46  ;;  %v927_v46 = vld [vmem:[#allocation2 + $0x20] sm:$0xff] }
 0x259   :  { %v2627_v52 = vadd.f32 %v635_v48, %v631_v49 }
 0x25a   :  { %v2629_v53 = vadd.f32 %v634_v51, %v630_v50 }
 0x25c   :  { %1847 = vmatprep.mubr.msk.f32.mxu1 %vm134_vm0, %v2629_v53  ;;  %1858 = vmatprep.mubr.msk.f32.mxu0 %vm134_vm0, %v2629_v53 }
 0x25d   :  { %1848 = vmatmul.mubr.msk.f32.vlgmr.msra.gmra.mrb[4].mxu1 %vm134_vm0, %v2627_v52  ;;  %1859 = vmatmul.mubr.msk.f32.vlgmr.msra.gmra.mrb[10].mxu0 %vm134_vm0, %v2627_v52 }
 0x25e   :  { %2000 = vmatpush3.bf16.msra.mxu1 %v2550_v28  ;;  %2008 = vmatpush3.bf16.msra.mxu0 %v2525_v11 }
 0x25f   :  { %2002 = vmatprep.subr.bf16.mxu1 %v2557_v32  ;;  %2010 = vmatprep.subr.bf16.mxu0 %v2527_v13 }
 0x262   :  { %2004 = vmatpush3.bf16.msra.mxu1 %v2557_v32  ;;  %2012 = vmatpush3.bf16.msra.mxu0 %v2527_v13 }
 0x263   :  { %2014 = vmatprep.subr.bf16.mxu1 %v2532_v16  ;;  %2022 = vmatprep.subr.bf16.mxu0 %v2550_v28 }
 0x330   :  { %v1849_v55 = vpop.f32.mrb[4].mxu1  ;;  %v1860_v56 = vpop.f32.mrb[10].mxu0 }
 0x331   :  { %v723_v57 = vadd.f32 %v1849_v55, %v640_v54  ;;  %v713_v59 = vpop.f32.mrb[5].mxu1  ;;  %v805_v60 = vpop.f32.mrb[11].mxu0  ;;  %v815_v9 = vadd.f32 %v1860_v56, %v738_v8 }
 0x332   :  { %v722_v61 = vadd.f32 %v713_v59, %v639_v58  ;;  %v814_v12 = vadd.f32 %v805_v60, %v737_v10  ;;  %v1026_v58 = vld [vmem:[#allocation3 + $0x28] sm:$0xff]  ;;  %v1025_v60 = vld [vmem:[#allocation3 + $0x20] sm:$0xff] }
 0x333   :  { %v1664_v62 = vmul.f32 -1.442695, %v723_v57  ;;  %v1668_v14 = vmul.f32 -1.442695, %v815_v9 }
 0x334   :  { %v1663_v63 = vmul.f32 -1.442695, %v722_v61  ;;  %v1667_v15 = vmul.f32 -1.442695, %v814_v12 }
 0x335   :  { %2094 = vpow2.f32 %v1664_v62 }
 0x336   :  { %2096 = vpow2.f32 %v1663_v63 }
 0x33f   :  { %v2095_v0 = vpop.eup %2094 }
 0x340   :  { %v731_v1 = vadd.f32 1.0, %v2095_v0  ;;  %v2097_v2 = vpop.eup %2096 }
 0x341   :  { %v730_v3 = vadd.f32 1.0, %v2097_v2 }
 0x342   :  { %2098 = vrcp.f32 %v731_v1 }
 0x343   :  { %2100 = vrcp.f32 %v730_v3 }
 0x344   :  { %2102 = vpow2.f32 %v1668_v14 }
 0x345   :  { %2104 = vpow2.f32 %v1667_v15 }
 0x34c   :  { %v2099_v4 = vpop.eup %2098 }
 0x34d   :  { %v2101_v5 = vpop.eup %2100  ;;  %v832_v7 = vmul.f32 %v2099_v4, %v2627_v52  ;;  %v1118_v4 = vld [vmem:[#allocation4 + $0x28] sm:$0xff] }
 0x34e   :  { %v831_v6 = vmul.f32 %v2101_v5, %v2629_v53  ;;  %v2103_v17 = vpop.eup %2102 }
 0x34f   :  { %v2105_v18 = vpop.eup %2104  ;;  %v823_v19 = vadd.f32 1.0, %v2103_v17 }
 0x350   :  { %1869 = vmatprep.mubr.msk.f32.mxu1 %vm134_vm0, %v831_v6  ;;  %v822_v21 = vadd.f32 1.0, %v2105_v18  ;;  %v1117_v6 = vld [vmem:[#allocation4 + $0x20] sm:$0xff] }
 0x351   :  { %1870 = vmatmul.mubr.msk.f32.vlgmr.msra.gmra.mrb[6].mxu1 %vm134_vm0, %v832_v7  ;;  %2106 = vrcp.f32 %v823_v19 }
 0x352   :  { %2016 = vmatpush3.bf16.msra.mxu1 %v2532_v16  ;;  %2108 = vrcp.f32 %v822_v21 }
 0x353   :  { %2018 = vmatprep.subr.bf16.mxu1 %v2537_v20 }
 0x356   :  { %2020 = vmatpush3.bf16.msra.mxu1 %v2537_v20 }
 0x357   :  { %2030 = vmatprep.subr.bf16.mxu1 %v2525_v11 }
 0x35b   :  { %v2107_v29 = vpop.eup %2106 }
 0x35c   :  { %v2109_v30 = vpop.eup %2108  ;;  %v921_v31 = vsub.f32 1.0, %v2107_v29  ;;  %v919_v37 = vmul.f32 %v2107_v29, %v2627_v52  ;;  %v1215_v29 = vld [vmem:[#allocation2 + $0x30] sm:$0xff] }
 0x35d   :  { %v920_v34 = vsub.f32 1.0, %v2109_v30  ;;  %v918_v38 = vmul.f32 %v2109_v30, %v2629_v53 }
 0x424   :  { %v1871_v23 = vpop.f32.mrb[6].mxu1 }
 0x425   :  { %v915_v24 = vadd.f32 %v1871_v23, %v830_v22  ;;  %v905_v26 = vpop.f32.mrb[7].mxu1 }
 0x426   :  { %v914_v27 = vadd.f32 %v905_v26, %v829_v25 }
 0x427   :  { %2110 = vtanh.f32 %v915_v24  ;;  %v1216_v24 = vld [vmem:[#allocation2 + $0x38] sm:$0xff] }
 0x428   :  { %2112 = vtanh.f32 %v914_v27 }
 0x431   :  { %v2111_v33 = vpop.eup %2110 }
 0x432   :  { %v2113_v35 = vpop.eup %2112  ;;  %v923_v36 = vmul.f32 %v2111_v33, %v921_v31 }
 0x433   :  { %v922_v39 = vmul.f32 %v2113_v35, %v920_v34 }
 0x434   :  { %v2657_v40 = vadd.f32 %v923_v36, %v919_v37 }
 0x435   :  { %v2659_v41 = vadd.f32 %v922_v39, %v918_v38 }
 0x437   :  { %1880 = vmatprep.mubr.msk.f32.mxu0 %vm134_vm0, %v2659_v41  ;;  %1891 = vmatprep.mubr.msk.f32.mxu1 %vm134_vm0, %v2659_v41 }
 0x438   :  { %1881 = vmatmul.mubr.msk.f32.vlgmr.msra.gmra.mrb[12].mxu0 %vm134_vm0, %v2657_v40  ;;  %1892 = vmatmul.mubr.msk.f32.vlgmr.msra.gmra.mrb[8].mxu1 %vm134_vm0, %v2657_v40 }
 0x439   :  { %2024 = vmatpush3.bf16.msra.mxu0 %v2550_v28  ;;  %2032 = vmatpush3.bf16.msra.mxu1 %v2525_v11 }
 0x43a   :  { %2026 = vmatprep.subr.bf16.mxu0 %v2557_v32  ;;  %2034 = vmatprep.subr.bf16.mxu1 %v2527_v13 }
 0x43d   :  { %2028 = vmatpush3.bf16.msra.mxu0 %v2557_v32  ;;  %2036 = vmatpush3.bf16.msra.mxu1 %v2527_v13 }
 0x43e   :  { %2038 = vmatprep.subr.bf16.mxu0 %v2532_v16  ;;  %2046 = vmatprep.subr.bf16.mxu1 %v2550_v28 }
 0x50b   :  { %v1882_v43 = vpop.f32.mrb[12].mxu0  ;;  %v1893_v44 = vpop.f32.mrb[8].mxu1 }
 0x50c   :  { %v1011_v45 = vadd.f32 %v1882_v43, %v928_v42  ;;  %v1001_v47 = vpop.f32.mrb[13].mxu0  ;;  %v1093_v48 = vpop.f32.mrb[9].mxu1  ;;  %v1103_v59 = vadd.f32 %v1893_v44, %v1026_v58  ;;  %v1504_v42 = vld [vmem:[#allocation14] sm:$0xff]  ;;  %v1505_v43 = vld [vmem:[#allocation14 + $0x8] sm:$0xff] }
 0x50d   :  { %v1010_v11 = vadd.f32 %v1001_v47, %v927_v46  ;;  %v1102_v61 = vadd.f32 %v1093_v48, %v1025_v60  ;;  %v2053_v44 = vpack.c.bf16 %v1505_v43, %v1504_v42  ;;  %v1507_v46 = vld [vmem:[#allocation14 + $0x18] sm:$0xff] }
 0x50e   :  { %v1674_v49 = vmul.f32 -1.442695, %v1011_v45  ;;  %v1678_v62 = vmul.f32 -1.442695, %v1103_v59  ;;  %v1506_v45 = vld [vmem:[#allocation14 + $0x10] sm:$0xff]  ;;  %v1314_v48 = vld [vmem:[#allocation3 + $0x38] sm:$0xff] }
 0x50f   :  { %v1673_v50 = vmul.f32 -1.442695, %v1010_v11  ;;  %v1677_v63 = vmul.f32 -1.442695, %v1102_v61  ;;  %v2057_v47 = vpack.c.bf16 %v1507_v46, %v1506_v45  ;;  %v1405_v59 = vld [vmem:[#allocation4 + $0x30] sm:$0xff] }
 0x510   :  { %2114 = vpow2.f32 %v1674_v49  ;;  %v1313_v49 = vld [vmem:[#allocation3 + $0x30] sm:$0xff] }
 0x511   :  { %2116 = vpow2.f32 %v1673_v50 }
 0x51a   :  { %v2115_v51 = vpop.eup %2114 }
 0x51b   :  { %v1019_v52 = vadd.f32 1.0, %v2115_v51  ;;  %v2117_v53 = vpop.eup %2116 }
 0x51c   :  { %v1018_v13 = vadd.f32 1.0, %v2117_v53 }
 0x51d   :  { %2118 = vrcp.f32 %v1019_v52 }
 0x51e   :  { %2120 = vrcp.f32 %v1018_v13 }
 0x51f   :  { %2122 = vpow2.f32 %v1678_v62 }
 0x520   :  { %2124 = vpow2.f32 %v1677_v63 }
 0x527   :  { %v2119_v54 = vpop.eup %2118 }
 0x528   :  { %v2121_v55 = vpop.eup %2120  ;;  %v1120_v57 = vmul.f32 %v2119_v54, %v2657_v40 }
 0x529   :  { %v1119_v56 = vmul.f32 %v2121_v55, %v2659_v41  ;;  %v2123_v0 = vpop.eup %2122 }
 0x52a   :  { %v2125_v1 = vpop.eup %2124  ;;  %v1111_v2 = vadd.f32 1.0, %v2123_v0 }
 0x52b   :  { %1902 = vmatprep.mubr.msk.f32.mxu0 %vm134_vm0, %v1119_v56  ;;  %v1110_v3 = vadd.f32 1.0, %v2125_v1  ;;  %v1406_v56 = vld [vmem:[#allocation4 + $0x38] sm:$0xff] }
 0x52c   :  { %1903 = vmatmul.mubr.msk.f32.vlgmr.msra.gmra.mrb[14].mxu0 %vm134_vm0, %v1120_v57  ;;  %2126 = vrcp.f32 %v1111_v2 }
 0x52d   :  { %2040 = vmatpush3.bf16.msra.mxu0 %v2532_v16  ;;  %2128 = vrcp.f32 %v1110_v3 }
 0x52e   :  { %2042 = vmatprep.subr.bf16.mxu0 %v2537_v20 }
 0x531   :  { %2044 = vmatpush3.bf16.msra.mxu0 %v2537_v20 }
 0x532   :  { %2054 = vmatprep.subr.bf16.mxu0 %v2053_v44 }
 0x536   :  { %v2127_v8 = vpop.eup %2126 }
 0x537   :  { %v2129_v9 = vpop.eup %2128  ;;  %v1209_v10 = vsub.f32 1.0, %v2127_v8  ;;  %v1207_v18 = vmul.f32 %v2127_v8, %v2657_v40 }
 0x538   :  { %v1208_v14 = vsub.f32 1.0, %v2129_v9  ;;  %v1206_v19 = vmul.f32 %v2129_v9, %v2659_v41 }
 0x5ff   :  { %v1904_v16 = vpop.f32.mrb[14].mxu0 }
 0x600   :  { %v1203_v5 = vadd.f32 %v1904_v16, %v1118_v4  ;;  %v1193_v7 = vpop.f32.mrb[15].mxu0 }
 0x601   :  { %v1202_v20 = vadd.f32 %v1193_v7, %v1117_v6 }
 0x602   :  { %2130 = vtanh.f32 %v1203_v5 }
 0x603   :  { %2132 = vtanh.f32 %v1202_v20 }
 0x60c   :  { %v2131_v12 = vpop.eup %2130 }
 0x60d   :  { %v2133_v15 = vpop.eup %2132  ;;  %v1211_v17 = vmul.f32 %v2131_v12, %v1209_v10 }
 0x60e   :  { %v1210_v21 = vmul.f32 %v2133_v15, %v1208_v14 }
 0x60f   :  { %v2686_v22 = vadd.f32 %v1211_v17, %v1207_v18 }
 0x610   :  { %v2688_v23 = vadd.f32 %v1210_v21, %v1206_v19 }
 0x612   :  { %1913 = vmatprep.mubr.msk.f32.mxu1 %vm134_vm0, %v2688_v23  ;;  %1924 = vmatprep.mubr.msk.f32.mxu0 %vm134_vm0, %v2688_v23 }
 0x613   :  { %1914 = vmatmul.mubr.msk.f32.vlgmr.msra.gmra.mrb[10].mxu1 %vm134_vm0, %v2686_v22  ;;  %1925 = vmatmul.mubr.msk.f32.vlgmr.msra.gmra.mrb[16].mxu0 %vm134_vm0, %v2686_v22 }
 0x614   :  { %2048 = vmatpush3.bf16.msra.mxu1 %v2550_v28  ;;  %2056 = vmatpush3.bf16.msra.mxu0 %v2053_v44 }
 0x615   :  { %2050 = vmatprep.subr.bf16.mxu1 %v2557_v32  ;;  %2058 = vmatprep.subr.bf16.mxu0 %v2057_v47 }
 0x618   :  { %2052 = vmatpush3.bf16.msra.mxu1 %v2557_v32  ;;  %2060 = vmatpush3.bf16.msra.mxu0 %v2057_v47 }
 0x6e6   :  { %v1915_v25 = vpop.f32.mrb[10].mxu1  ;;  %v1926_v26 = vpop.f32.mrb[16].mxu0 }
 0x6e7   :  { %v1299_v27 = vadd.f32 %v1915_v25, %v1216_v24  ;;  %v1289_v30 = vpop.f32.mrb[11].mxu1  ;;  %v1381_v31 = vpop.f32.mrb[17].mxu0  ;;  %v1391_v11 = vadd.f32 %v1926_v26, %v1314_v48 }
 0x6e8   :  { %v1298_v33 = vadd.f32 %v1289_v30, %v1215_v29  ;;  %v1390_v50 = vadd.f32 %v1381_v31, %v1313_v49 }
 0x6e9   :  { %v1684_v34 = vmul.f32 -1.442695, %v1299_v27  ;;  %v1688_v51 = vmul.f32 -1.442695, %v1391_v11 }
 0x6ea   :  { %v1683_v35 = vmul.f32 -1.442695, %v1298_v33  ;;  %v1687_v52 = vmul.f32 -1.442695, %v1390_v50 }
 0x6eb   :  { %2134 = vpow2.f32 %v1684_v34 }
 0x6ec   :  { %2136 = vpow2.f32 %v1683_v35 }
 0x6f5   :  { %v2135_v36 = vpop.eup %2134 }
 0x6f6   :  { %v1307_v37 = vadd.f32 1.0, %v2135_v36  ;;  %v2137_v38 = vpop.eup %2136 }
 0x6f7   :  { %v1306_v28 = vadd.f32 1.0, %v2137_v38 }
 0x6f8   :  { %2138 = vrcp.f32 %v1307_v37 }
 0x6f9   :  { %2140 = vrcp.f32 %v1306_v28 }
 0x6fa   :  { %2142 = vpow2.f32 %v1688_v51 }
 0x6fb   :  { %2144 = vpow2.f32 %v1687_v52 }
 0x702   :  { %v2139_v39 = vpop.eup %2138 }
 0x703   :  { %v2141_v32 = vpop.eup %2140  ;;  %v1408_v41 = vmul.f32 %v2139_v39, %v2686_v22 }
 0x704   :  { %v1407_v40 = vmul.f32 %v2141_v32, %v2688_v23  ;;  %v2143_v53 = vpop.eup %2142 }
 0x705   :  { %v2145_v13 = vpop.eup %2144  ;;  %v1399_v54 = vadd.f32 1.0, %v2143_v53 }
 0x706   :  { %1935 = vmatprep.mubr.msk.f32.mxu1 %vm134_vm0, %v1407_v40  ;;  %v1398_v55 = vadd.f32 1.0, %v2145_v13 }
 0x707   :  { %1936 = vmatmul.mubr.msk.f32.vlgmr.msra.gmra.mrb[12].mxu1 %vm134_vm0, %v1408_v41  ;;  %2146 = vrcp.f32 %v1399_v54 }
 0x708   :  { %2148 = vrcp.f32 %v1398_v55 }
 0x711   :  { %v2147_v62 = vpop.eup %2146 }
 0x712   :  { %v2149_v63 = vpop.eup %2148  ;;  %v1497_v0 = vsub.f32 1.0, %v2147_v62  ;;  %v1495_v16 = vmul.f32 %v2147_v62, %v2686_v22 }
 0x713   :  { %v1496_v2 = vsub.f32 1.0, %v2149_v63  ;;  %v1494_v5 = vmul.f32 %v2149_v63, %v2688_v23 }
 0x7da   :  { %v1937_v57 = vpop.f32.mrb[12].mxu1 }
 0x7db   :  { %v1491_v58 = vadd.f32 %v1937_v57, %v1406_v56  ;;  %v1481_v60 = vpop.f32.mrb[13].mxu1 }
 0x7dc   :  { %v1490_v61 = vadd.f32 %v1481_v60, %v1405_v59 }
 0x7dd   :  { %2150 = vtanh.f32 %v1491_v58 }
 0x7de   :  { %2152 = vtanh.f32 %v1490_v61 }
 0x7e7   :  { %v2151_v1 = vpop.eup %2150 }
 0x7e8   :  { %v2153_v3 = vpop.eup %2152  ;;  %v1499_v4 = vmul.f32 %v2151_v1, %v1497_v0 }
 0x7e9   :  { %v1498_v6 = vmul.f32 %v2153_v3, %v1496_v2 }
 0x7ea   :  { %v1501_v7 = vadd.f32 %v1499_v4, %v1495_v16 }
 0x7eb   :  { %v1500_v20 = vadd.f32 %v1498_v6, %v1494_v5 }
 0x7ec   :  { %1503 = vst.msk [vmem:[#allocation17 + $0x8] sm:$0xff] %vm134_vm0, %v1501_v7 }
 0x7ed   :  { %1946 = vmatprep.mubr.msk.f32.mxu0 %vm134_vm0, %v1500_v20  ;;  %1502 = vst.msk [vmem:[#allocation17] sm:$0xff] %vm134_vm0, %v1500_v20 }
 0x7ee   :  { %1947 = vmatmul.mubr.msk.f32.vlgmr.msra.gmra.mrb[18].mxu0 %vm134_vm0, %v1501_v7 }
 0x7ef   :  { %2305 = shalt.err (!%p2302_p10)
}
 0x7f0   :  { %s2306_s26 = scalar_lea.hbm %s2755_s9, 256 }
 0x7f1   :  { %p2307_p11 = scmp.ne.s32.totalorder %s2755_s9, %s2306_s26  ;;  %p2310_p12 = scmp.lt.u32.totalorder %s2306_s26, %s2755_s9 }
 0x7f3   :  { %p2312_p13 = pnand %p2310_p12, %p2307_p11 }
 0x7f5   :  { %2315 = shalt.err (!%p2312_p13)
}
 0x7f6   :  { %1633 = dma.vmem_to_hbm [thread:$0]  %s1628_s20, 256, %s2755_s9, [#allocation18], %s2352_s21, %s2352_s21, %s2353_s22  }
 0x7f7   :  { %v1691_v8 = vld [vmem:[%s2753_s7] ss:$0 sm:$0xff]  ;;  %s2362_s11 = smov [#allocation16]  }
 0x7f8   :  { %s1615_s9 = sshll.u32 %s2362_s11, 4  ;;  %s1616_s9 = int_to_ptr.vmem [resolvable:$true] %s1615_s9 }
 0x7f9   :  { %s2316_s7 = scalar_lea.vmem %s1616_s9, 256  ;;  %p2321_p1 = scmp.lt.s32.totalorder %s1616_s9, %s1616_s9 }
 0x7fa   :  { %p2317_p0 = scmp.ne.s32.totalorder %s1616_s9, %s2316_s7  ;;  %p2322_p2 = scmp.lt.s32.totalorder %s2316_s7, %s2316_s7 }
 0x7fc   :  { %p2323_p3 = por %p2322_p2, %p2321_p1 }
 0x7fe   :  { %p2324_p4 = pnand %p2323_p3, %p2317_p0 }
 0x8c1   :  { %v1948_v9 = vpop.f32.mrb[18].mxu0 }
 0x8c2   :  { %v1593_v10 = vadd.f32 %v1948_v9, %v1691_v8  ;;  %v1587_v12 = vpop.f32.mrb[19].mxu0 }
 0x8c3   :  { %v1588_v14 = vadd.f32 %v1691_v8, %v1587_v12 }
 0x8c4   :  { %v1695_v15 = vmul.f32 -1.442695, %v1593_v10 }
 0x8c5   :  { %v1694_v17 = vmul.f32 -1.442695, %v1588_v14 }
 0x8c6   :  { %2154 = vpow2.f32 %v1695_v15 }
 0x8c7   :  { %2156 = vpow2.f32 %v1694_v17 }
 0x8d0   :  { %v2155_v18 = vpop.eup %2154 }
 0x8d1   :  { %v2157_v19 = vpop.eup %2156  ;;  %v1603_v21 = vadd.f32 1.0, %v2155_v18 }
 0x8d2   :  { %v1602_v22 = vadd.f32 1.0, %v2157_v19 }
 0x8d3   :  { %2158 = vrcp.f32 %v1603_v21 }
 0x8d4   :  { %2160 = vrcp.f32 %v1602_v22 }
 0x8dd   :  { %v2159_v23 = vpop.eup %2158 }
 0x8de   :  { %v2161_v24 = vpop.eup %2160  ;;  %1609 = vst.msk [vmem:[#allocation16 + $0x8] sm:$0xff] %vm134_vm0, %v2159_v23 }
 0x8df   :  { %1608 = vst.msk [vmem:[#allocation16] sm:$0xff] %vm134_vm0, %v2161_v24 }
 0x8e0   :  { %2327 = shalt.err (!%p2324_p4)
}
 0x8e1   :  { %s2328_s10 = scalar_lea.hbm %s2754_s8, 256 }
 0x8e2   :  { %p2329_p5 = scmp.ne.s32.totalorder %s2754_s8, %s2328_s10  ;;  %p2332_p6 = scmp.lt.u32.totalorder %s2328_s10, %s2754_s8 }
 0x8e4   :  { %p2334_p7 = pnand %p2332_p6, %p2329_p5 }
 0x8e6   :  { %2337 = shalt.err (!%p2334_p7)
}
 0x8e7   :  { %1621 = dma.vmem_to_hbm [thread:$0]  %s1616_s9, 256, %s2754_s8, [#allocation7], %s2352_s21, %s2352_s21, %s2353_s22  }
 0x8e8   :  { %2346 = dma.done.wait [#allocation7], 256  }
 0x8e9   :  { %2347 = vsyncadd [#allocation7], 4294967040 }
 0x8ea   :  { %2348 = dma.done.wait [#allocation18], 256  }
 0x8eb   :  { %2349 = vsyncadd [#allocation18], 4294967040 }
 0x8ec   :  { %1640 = vsyncpa [#allocation6], 1 }
 0x8ed   :  { %1641 = vsyncpa [#allocation9], 1 }
 0x8ee   :  { %1642 = vsyncpa [#allocation12], 1 }
 0x8ef   :  { %1643 = vsyncpa [#allocation15], 1 }
 0x8f0   :  { %1644 = vsyncpa [#allocation7], 1 }
 0x8f1   :  { %1645 = vsyncpa [#allocation18], 1 }

</bundles_post_ra>
